<compile_context>
chip_gen: v5e
topology: v5e:2x2
jax: 0.10.0
libtpu: 0.0.40
codegen_flags: <defaults>
</compile_context>

<pallas_src>
import jax
import jax.numpy as jnp
from jax.experimental import pallas as pl
from jax.experimental.pallas import tpu as pltpu


# ---------------------------------------------------------------------------
# Problem setup (mirrors the PyTorch script)
# ---------------------------------------------------------------------------
sentences = ['i like dog', 'i love coffee', 'i hate milk']
word_list = sorted(set(" ".join(sentences).split()))   # deterministic order
word_dict = {w: i for i, w in enumerate(word_list)}

n_class = len(word_dict)                 # |V| = 7
m = 2                                    # embedding dim
n_step = len(sentences[0].split()) - 1   # 2
n_hidden = 2


# ---------------------------------------------------------------------------
# Pallas kernel:
#   multihot[b, s*n_class + v] = 1 iff X[b, s] == v
#   xhw    = [d|b] + multihot @ CHW          (single MXU op, C pre-folded)
#   hidden = tanh(xhw[:, :n_hidden])
#   out    = xhw[:, n_hidden:] + hidden @ U
# ---------------------------------------------------------------------------
def nnlm_kernel(x_ref, chw_ref, db_ref, u_ref, out_ref):
    idx = x_ref[...]                                   # [B, n_step] int32
    B = idx.shape[0]

    # Single hoisted lane iota over the fused (step, vocab) axis.
    full_iota = jax.lax.broadcasted_iota(jnp.int32, (B, n_step * n_class), 1)

    # Multi-hot select: per-step compares are cheap VPU ops (static unroll,
    # n_step == 2); no per-step matmul, no lane concatenation.
    multihot = jnp.zeros((B, n_step * n_class), jnp.float32)
    for s in range(n_step):
        multihot = multihot + (
            full_iota == (idx[:, s:s + 1] + s * n_class)
        ).astype(jnp.float32)

    # One fused projection (embedding gather + H|W matmul) + fused d|b bias.
    xhw = db_ref[...] + jnp.dot(multihot, chw_ref[...],
                                preferred_element_type=jnp.float32)   # [B, n_hidden+n_class]

    # TODO(synk): at real vocab sizes, pad n_hidden/n_class to multiples of 128
    # (or emit hidden/out as separate lane-aligned slabs) so this column-2
    # slice and the n_class-wide store stay unmasked / XLU-free.
    hidden = jnp.tanh(xhw[:, :n_hidden])               # [B, n_hidden]
    out_ref[...] = xhw[:, n_hidden:] + jnp.dot(
        hidden, u_ref[...], preferred_element_type=jnp.float32)       # [B, n_class]


# ---------------------------------------------------------------------------
# Parameter prep (one-time, batch independent)
# ---------------------------------------------------------------------------
def prepare_params(C, H, W, d, b):
    """Fold the embedding table C into the fused [H|W] projection.

    CHW[s*n_class:(s+1)*n_class, :] = C @ [H|W][s*m:(s+1)*m, :]
    db = [d | b]
    """
    HW = jnp.concatenate([H, W], axis=1).astype(jnp.float32)   # [n_step*m, n_hidden+n_class]
    CHW = jnp.concatenate(
        [C.astype(jnp.float32) @ HW[s * m:(s + 1) * m, :] for s in range(n_step)],
        axis=0,
    )                                                          # [n_step*n_class, n_hidden+n_class]
    db = jnp.concatenate([d, b]).reshape(1, n_hidden + n_class).astype(jnp.float32)
    return CHW, db


# ---------------------------------------------------------------------------
# Wrapper (jitted; pl.CostEstimate so XLA schedules around the custom call)
# ---------------------------------------------------------------------------
def _nnlm_forward(X_idx, CHW, db, U):
    B = X_idx.shape[0]
    no = n_hidden + n_class
    vmem = pl.BlockSpec(memory_space=pltpu.MemorySpace.VMEM)
    flops = 2 * B * (n_step * n_class) * no + 2 * B * n_hidden * n_class
    bytes_accessed = 4 * (X_idx.size + CHW.size + db.size + U.size + B * n_class)
    return pl.pallas_call(
        nnlm_kernel,
        out_shape=jax.ShapeDtypeStruct((B, n_class), jnp.float32),
        in_specs=[vmem] * 4,
        out_specs=vmem,
        cost_estimate=pl.CostEstimate(
            flops=flops,
            transcendentals=B * n_hidden,
            bytes_accessed=bytes_accessed,
        ),
    )(X_idx, CHW, db, U)


nnlm_forward = jax.jit(_nnlm_forward)


# ---------------------------------------------------------------------------
# Main: deterministic params, deterministic inputs, run once.
# ---------------------------------------------------------------------------
if __name__ == "__main__":
    key = jax.random.PRNGKey(0)
    kC, kH, kW, kd, kU, kb = jax.random.split(key, 6)

    # Parameters (same shapes as the PyTorch module, randn-style init)
    C = jax.random.normal(kC, (n_class, m), dtype=jnp.float32)            # Embedding table
    H = jax.random.normal(kH, (n_step * m, n_hidden), dtype=jnp.float32)
    W = jax.random.normal(kW, (n_step * m, n_class), dtype=jnp.float32)
    d = jax.random.normal(kd, (n_hidden,), dtype=jnp.float32)
    U = jax.random.normal(kU, (n_hidden, n_class), dtype=jnp.float32)
    b = jax.random.normal(kb, (n_class,), dtype=jnp.float32)

    # Input batch: the first n_step words of each training sentence.
    X_idx = jnp.array(
        [[word_dict[w] for w in s.split()[:n_step]] for s in sentences],
        dtype=jnp.int32,
    )  # [3, 2]

    CHW, db = prepare_params(C, H, W, d, b)
    out = nnlm_forward(X_idx, CHW, db, U)
    out = jax.block_until_ready(out)

    # Pure-JAX reference of the original (unfused) forward semantics.
    emb = jnp.take(C, X_idx, axis=0).reshape(X_idx.shape[0], n_step * m)
    hidden_ref = jnp.tanh(d + emb @ H)
    out_ref = b + emb @ W + hidden_ref @ U
    assert out.shape == (X_idx.shape[0], n_class)
    assert jnp.allclose(out, out_ref, atol=1e-5, rtol=1e-5)

    print("KERNEL_OK")
</pallas_src>

<mosaic_0001>
module attributes {stable_mosaic.version = 11 : i64} {
  func.func @nnlm_kernel(%arg0: memref<3x2xi32, #tpu.memory_space<vmem>>, %arg1: memref<14x9xf32, #tpu.memory_space<vmem>>, %arg2: memref<1x9xf32, #tpu.memory_space<vmem>>, %arg3: memref<2x7xf32, #tpu.memory_space<vmem>>, %arg4: memref<3x7xf32, #tpu.memory_space<vmem>>) attributes {dimension_semantics = [], scalar_prefetch = 0 : i64, scratch_operands = 0 : i64, tpu.core_type = #tpu.core_type<tc>} {
    %c0 = arith.constant 0 : index
    %c0_0 = arith.constant 0 : index
    %0 = vector.load %arg0[%c0, %c0_0] : memref<3x2xi32, #tpu.memory_space<vmem>>, vector<3x2xi32>
    %1 = tpu.iota {dimensions = array<i32: 1>} : vector<3x14xi32>
    %cst = arith.constant 0.000000e+00 : f32
    %2 = vector.broadcast %cst : f32 to vector<3x14xf32>
    %3 = vector.extract_strided_slice %0 {offsets = [0, 0], sizes = [3, 1], strides = [1, 1]} : vector<3x2xi32> to vector<3x1xi32>
    %c0_i32 = arith.constant 0 : i32
    %4 = vector.broadcast %c0_i32 : i32 to vector<3x1xi32>
    %5 = arith.addi %3, %4 : vector<3x1xi32>
    %6 = vector.broadcast %5 : vector<3x1xi32> to vector<3x14xi32>
    %7 = arith.cmpi eq, %1, %6 : vector<3x14xi32>
    %8 = arith.extui %7 : vector<3x14xi1> to vector<3x14xi32>
    %9 = arith.sitofp %8 : vector<3x14xi32> to vector<3x14xf32>
    %10 = arith.addf %2, %9 : vector<3x14xf32>
    %11 = vector.extract_strided_slice %0 {offsets = [0, 1], sizes = [3, 1], strides = [1, 1]} : vector<3x2xi32> to vector<3x1xi32>
    %c7_i32 = arith.constant 7 : i32
    %12 = vector.broadcast %c7_i32 : i32 to vector<3x1xi32>
    %13 = arith.addi %11, %12 : vector<3x1xi32>
    %14 = vector.broadcast %13 : vector<3x1xi32> to vector<3x14xi32>
    %15 = arith.cmpi eq, %1, %14 : vector<3x14xi32>
    %16 = arith.extui %15 : vector<3x14xi1> to vector<3x14xi32>
    %17 = arith.sitofp %16 : vector<3x14xi32> to vector<3x14xf32>
    %18 = arith.addf %10, %17 : vector<3x14xf32>
    %c0_1 = arith.constant 0 : index
    %c0_2 = arith.constant 0 : index
    %19 = vector.load %arg2[%c0_1, %c0_2] : memref<1x9xf32, #tpu.memory_space<vmem>>, vector<1x9xf32>
    %c0_3 = arith.constant 0 : index
    %c0_4 = arith.constant 0 : index
    %20 = vector.load %arg1[%c0_3, %c0_4] : memref<14x9xf32, #tpu.memory_space<vmem>>, vector<14x9xf32>
    %cst_5 = arith.constant dense<0.000000e+00> : vector<3x9xf32>
    %21 = tpu.matmul %18, %20, %cst_5 {dimension_numbers = #tpu.dot_dimension_numbers<[1], [0], [0], [1], [0, 0, 1, 1], [], []>} : vector<3x14xf32>, vector<14x9xf32>, vector<3x9xf32> -> vector<3x9xf32>
    %22 = vector.broadcast %19 : vector<1x9xf32> to vector<3x9xf32>
    %23 = arith.addf %22, %21 : vector<3x9xf32>
    %24 = vector.extract_strided_slice %23 {offsets = [0, 0], sizes = [3, 2], strides = [1, 1]} : vector<3x9xf32> to vector<3x2xf32>
    %25 = math.tanh %24 : vector<3x2xf32>
    %26 = vector.extract_strided_slice %23 {offsets = [0, 2], sizes = [3, 7], strides = [1, 1]} : vector<3x9xf32> to vector<3x7xf32>
    %c0_6 = arith.constant 0 : index
    %c0_7 = arith.constant 0 : index
    %27 = vector.load %arg3[%c0_6, %c0_7] : memref<2x7xf32, #tpu.memory_space<vmem>>, vector<2x7xf32>
    %cst_8 = arith.constant dense<0.000000e+00> : vector<3x7xf32>
    %28 = tpu.matmul %25, %27, %cst_8 {dimension_numbers = #tpu.dot_dimension_numbers<[1], [0], [0], [1], [0, 0, 1, 1], [], []>} : vector<3x2xf32>, vector<2x7xf32>, vector<3x7xf32> -> vector<3x7xf32>
    %29 = arith.addf %26, %28 : vector<3x7xf32>
    %c0_9 = arith.constant 0 : index
    %c0_10 = arith.constant 0 : index
    %30 = vector.load %arg4[%c0_9, %c0_10] : memref<3x7xf32, #tpu.memory_space<vmem>>, vector<3x7xf32>
    tpu.vector_store %arg4[%c0_9, %c0_10], %29 {strides = array<i32>} : memref<3x7xf32, #tpu.memory_space<vmem>>, vector<3x7xf32>,
    return
  }
}

</mosaic_0001>

<bundles_post_ra>
// kernel: _nnlm_forward.1
= control target key start
LH: loop header
LB: loop body
LE: loop exit
PB: predicated region body
PF: predicated region fallthrough
CT: control target
= control target key end

     0   :  { %9 = vsyncpa [#allocation3], 0  ;;  %s266_s0 = inlined_call_operand.vmem [shape: s32[3,2], index: 0, kind: input, shape index: {}]   ;;  %s267_s1 = inlined_call_operand.hbm [shape: f32[14,9], index: 1, kind: input, shape index: {}]   ;;  %s268_s2 = inlined_call_operand.vmem [shape: f32[1,9], index: 2, kind: input, shape index: {}]   ;;  %s269_s3 = inlined_call_operand.vmem [shape: f32[2,7], index: 3, kind: input, shape index: {}]   ;;  %s270_s4 = inlined_call_operand.hbm [shape: f32[3,7], index: 4, kind: output, shape index: {}]  }
   0x1   :  { %10 = vsyncpa [#allocation4], 0  ;;  %s17_s17 = sshll.u32 %s267_s1, 4  ;;  %s217_s18 = smov [#allocation2]   ;;  %s18_s17 = int_to_ptr.hbm [resolvable:$true] %s17_s17 }
   0x2   :  { %s19_s19 = sshll.u32 %s217_s18, 4  ;;  %s218_s20 = smov 128   ;;  %s20_s19 = int_to_ptr.vmem [resolvable:$true] %s19_s19 }
   0x3   :  { %s219_s21 = smov 8  }
   0x4   :  { %25 = dma.hbm_to_vmem [thread:$0]  %s18_s17, 256, %s20_s19, [#allocation3], %s218_s20, %s218_s20, %s219_s21  }
   0x5   :  { %213 = dma.done.wait [#allocation3], 256  }
   0x6   :  { %214 = vsyncadd [#allocation3], 4294967040  ;;  %v220_v0 = vmov 0   ;;  %v34_v1 = vld [vmem:[%s266_s0] sm:$0x7]  ;;  %v221_v3 = vmov 1   ;;  %v35_v6 = vlaneseq }
   0x7   :  { %160 = vset.pattern.permute.xlu0 %v220_v0  ;;  %v44_v2 = vadd.s32 7, %v34_v1  ;;  %v54_v4 = vld [vmem:[#allocation2 + $0x8] sm:$0x3f]  ;;  %vm59_vm0 = vcmask 1045504   ;;  %v53_v5 = vld [vmem:[#allocation2] sm:$0xff]  ;;  %v222_v10 = vmov 0.0  }
   0x8   :  { %38 = vperm.xlu0 %160, %v34_v1   ;;  %147 = vmatpush.msk.msra.mxu0 %vm59_vm0, %v54_v4  ;;  %v36_v8 = vand.u32 127, %v35_v6  ;;  %vm55_vm3 = vcmask 113664   ;;  %v88_v14 = vld [vmem:[%s269_s3] sm:$0x3]  ;;  %vm93_vm4 = vcmask 1041408   ;;  %vm89_vm5 = vcmask 15360  }
   0x9   :  { %149 = vmatpush.msk.msra.mxu1 %vm93_vm4, %v88_v14  ;;  %v162_v15 = vld [vmem:[%s268_s2] ss:$0 sm:$0xff]  ;;  %s223_s26 = smov 2   ;;  %s224_s27 = smov 126   ;;  %vm126_vm6 = vcmask 51200  }
   0xa   :  { %78 = vmatpush.msra.mxu0 %v53_v5  ;;  %s225_s3 = smov [#allocation5]   ;;  %s135_s5 = sshll.u32 %s270_s4, 4  ;;  %s136_s5 = int_to_ptr.hbm [resolvable:$true] %s135_s5 }
   0xb   :  { %s133_s28 = sshll.u32 %s225_s3, 4  ;;  %s134_s28 = int_to_ptr.vmem [resolvable:$true] %s133_s28 }
  0x10   :  { %161 = vset.pattern.permute.xlu0 %v221_v3 }
  0x11   :  { %46 = vperm.xlu0 %161, %v44_v2  }
  0x7a   :  { %v39_v7 = vpop.permute.xlu0 %38 }
  0x7b   :  { %vm40_vm1 = vcmp.eq.s32.totalorder %v36_v8, %v39_v7 }
  0x7c   :  { %v145_v11 = vsel %vm40_vm1, 1.0, %v222_v10 }
  0x83   :  { %v47_v9 = vpop.permute.xlu0 %46 }
  0x84   :  { %vm48_vm2 = vcmp.eq.s32.totalorder %v36_v8, %v47_v9 }
  0x85   :  { %v146_v12 = vsel %vm48_vm2, 1.0, %v222_v10 }
  0x86   :  { %v51_v13 = vadd.f32 %v146_v12, %v145_v11 }
  0x88   :  { %148 = vmatmul.msk.f32.vlgmr.msra.gmra.mxu0 %vm55_vm3, %v51_v13 }
 0x105   :  { %v80_v16 = vpop.f32.mrf.mxu0 }
 0x106   :  { %v86_v17 = vadd.f32 %v162_v15, %v80_v16 }
 0x108   :  { %163 = vtanh.f32 %v86_v17 }
 0x10e   :  { %v164_v18 = vpop.eup %163 }
 0x10f   :  { %150 = vmatmul.msk.f32.vlgmr.msra.gmra.mxu1 %vm89_vm5, %v164_v18 }
 0x18c   :  { %v114_v19 = vpop.f32.mrf.mxu1 }
 0x18d   :  { %118 = vrot.lane.b32.xlu1 %v114_v19, %s223_s26 }
 0x1ff   :  { %v119_v20 = vpop.permute.xlu1 %118 }
 0x200   :  { %v121_v21 = vadd.f32 %v119_v20, %v86_v17 }
 0x202   :  { %123 = vrot.lane.b32.xlu1 %v121_v21, %s224_s27 }
 0x274   :  { %v124_v22 = vpop.permute.xlu1 %123 }
 0x275   :  { %127 = vst.msk [vmem:[#allocation5] sm:$0x7] %vm126_vm6, %v124_v22 }
 0x276   :  { %138 = dma.vmem_to_hbm [thread:$0]  %s134_s28, 64, %s136_s5, [#allocation4]  }
 0x277   :  { %215 = dma.done.wait [#allocation4], 64  }
 0x278   :  { %216 = vsyncadd [#allocation4], 4294967232 }
 0x279   :  { %143 = vsyncpa [#allocation3], 1 }
 0x27a   :  { %144 = vsyncpa [#allocation4], 1 }

</bundles_post_ra>
